<compile_context>
chip_gen: v7x
topology: tpu7x:2x2x1
jax: 0.10.0
libtpu: 0.0.40
codegen_flags: <defaults>
</compile_context>

<pallas_src>
import functools

import jax
import jax.numpy as jnp
from jax import lax
from jax.experimental import pallas as pl
from jax.experimental.pallas import tpu as pltpu


def _round_up(x, m):
    return (x + m - 1) // m * m


def _dropout(h, seed_u32, layer_idx, row0_u32, p):
    """Inverted dropout with a counter-based hash PRNG (pure jnp ops)."""
    if p <= 0.0:
        return h
    shape = h.shape
    rows = lax.broadcasted_iota(jnp.int32, shape, 0).astype(jnp.uint32) + row0_u32
    cols = lax.broadcasted_iota(jnp.int32, shape, 1).astype(jnp.uint32)
    # Per-layer salt (computed in Python so it's a compile-time constant).
    salt = jnp.uint32((layer_idx * 0x9E3779B9 + 0x27D4EB2F) & 0xFFFFFFFF)
    x = rows * jnp.uint32(0x9E3779B1) + cols * jnp.uint32(0x85EBCA77)
    x = x ^ (seed_u32 + salt)
    # murmur/splitmix-style finalizer: a few VPU-only int ops per element.
    x = x ^ lax.shift_right_logical(x, jnp.uint32(16))
    x = x * jnp.uint32(0x7FEB352D)
    x = x ^ lax.shift_right_logical(x, jnp.uint32(15))
    x = x * jnp.uint32(0x846CA68B)
    x = x ^ lax.shift_right_logical(x, jnp.uint32(16))
    # Integer threshold compare on the low 24 bits (fits in int32 exactly).
    bits24 = (x & jnp.uint32(0x00FFFFFF)).astype(jnp.int32)
    threshold = jnp.int32(int(p * (1 << 24)))
    keep = bits24 >= threshold                       # P(keep) = 1 - p
    scale = jnp.float32(1.0 / (1.0 - p))
    return jnp.where(keep, h * scale, jnp.float32(0.0))


def _prenet_fused_kernel(seed_ref, x_ref, *rest, p, tm, n_layers):
    """rest = (w1, b1, w2, b2, ..., o_ref). All layers fused; intermediate
    activations live in VMEM/vregs only."""
    wb_refs = rest[: 2 * n_layers]
    o_ref = rest[2 * n_layers]

    i = pl.program_id(0)
    row0 = (i * tm).astype(jnp.uint32)               # global row offset of this tile
    seed = seed_ref[0].astype(jnp.uint32)

    h = x_ref[...]                                   # (tm, d_in) f32
    for l in range(n_layers):
        w_ref = wb_refs[2 * l]                       # (d_in, d_out) bf16
        b_ref = wb_refs[2 * l + 1]                   # (1, d_out)   f32
        z = jnp.dot(h.astype(jnp.bfloat16), w_ref[...],
                    preferred_element_type=jnp.float32)
        z = jnp.maximum(z + b_ref[...], 0.0)         # bias + ReLU in f32
        h = _dropout(z, seed, l, row0, p)
    o_ref[...] = h.astype(o_ref.dtype)


def init_prenet_params(key, in_dim, sizes):
    """PyTorch-style Linear init U(-1/sqrt(fan_in), 1/sqrt(fan_in)).

    Weights are stored pre-transposed as (in, out) and pre-cast to bf16 so the
    forward pass does no per-call transpose/cast glue.
    """
    in_sizes = [in_dim] + list(sizes[:-1])
    params = []
    for d_in, d_out in zip(in_sizes, sizes):
        key, kw, kb = jax.random.split(key, 3)
        bound = 1.0 / (d_in ** 0.5)
        w = jax.random.uniform(kw, (d_out, d_in), jnp.float32, -bound, bound)
        b = jax.random.uniform(kb, (d_out,), jnp.float32, -bound, bound)
        w_t = jnp.transpose(w).astype(jnp.bfloat16)          # (d_in, d_out) bf16
        params.append((w_t, b.reshape(1, -1).astype(jnp.float32)))
    return params


def prenet_forward(x, params, *, dropout_p=0.5, seed=0, tile_rows=512):
    """x: (B, T, in_dim) f32 -> (B, T, sizes[-1]) f32. Training-mode dropout."""
    assert 0.0 <= dropout_p < 1.0, "dropout_p must be in [0, 1)"
    b_dim, t_dim, in_dim = x.shape
    n = b_dim * t_dim
    n_layers = len(params)
    d_out = params[-1][0].shape[1]

    h = x.reshape(n, in_dim).astype(jnp.float32)

    # Row tile: as large as sensible, multiple of 8 (sublane), padded N.
    tm = min(tile_rows, _round_up(n, 8))
    tm = _round_up(tm, 8)
    n_pad = _round_up(n, tm)
    if n_pad != n:
        h = jnp.pad(h, ((0, n_pad - n), (0, 0)))

    grid = (n_pad // tm,)

    in_specs = [pl.BlockSpec((tm, in_dim), lambda i, s: (i, 0))]
    operands = [h]
    for w_t, b2 in params:
        d_o = w_t.shape[1]
        # Weights / biases: single block, constant across the grid -> resident.
        in_specs.append(pl.BlockSpec(w_t.shape, lambda i, s: (0, 0)))
        in_specs.append(pl.BlockSpec((1, d_o), lambda i, s: (0, 0)))
        operands.append(w_t)
        operands.append(b2)

    kernel = functools.partial(
        _prenet_fused_kernel, p=float(dropout_p), tm=tm, n_layers=n_layers)

    out = pl.pallas_call(
        kernel,
        out_shape=jax.ShapeDtypeStruct((n_pad, d_out), jnp.float32),
        grid_spec=pltpu.PrefetchScalarGridSpec(
            num_scalar_prefetch=1,              # seed lands in SMEM
            grid=grid,
            in_specs=in_specs,
            out_specs=pl.BlockSpec((tm, d_out), lambda i, s: (i, 0)),
        ),
        compiler_params=pltpu.CompilerParams(
            dimension_semantics=("parallel",)),  # row axis: megacore-shardable
    )(jnp.asarray([seed], jnp.int32), *operands)

    return out[:n].reshape(b_dim, t_dim, d_out)


if __name__ == "__main__":
    key = jax.random.PRNGKey(0)
    k_x, k_p = jax.random.split(key)

    B, T, IN_DIM = 2, 8, 32
    SIZES = [256, 128]

    x = jax.random.normal(k_x, (B, T, IN_DIM), jnp.float32)
    params = init_prenet_params(k_p, IN_DIM, SIZES)

    out = prenet_forward(x, params, dropout_p=0.5, seed=1234)
    out = jax.block_until_ready(out)

    assert out.shape == (B, T, SIZES[-1]), out.shape
    assert out.dtype == jnp.float32
    assert bool(jnp.all(jnp.isfinite(out)))
    assert bool(jnp.all(out >= 0.0))   # ReLU + dropout => non-negative
    print("KERNEL_OK")
</pallas_src>

<mosaic_0001>
module attributes {stable_mosaic.version = 11 : i64} {
  func.func @_prenet_fused_kernel(%arg0: i32, %arg1: memref<1xi32, #tpu.memory_space<smem>>, %arg2: memref<16x32xf32, #tpu.memory_space<vmem>>, %arg3: memref<32x256xbf16, #tpu.memory_space<vmem>>, %arg4: memref<1x256xf32, #tpu.memory_space<vmem>>, %arg5: memref<256x128xbf16, #tpu.memory_space<vmem>>, %arg6: memref<1x128xf32, #tpu.memory_space<vmem>>, %arg7: memref<16x128xf32, #tpu.memory_space<vmem>>) attributes {dimension_semantics = [#tpu.dimension_semantics<parallel>], iteration_bounds = array<i64: 1>, scalar_prefetch = 1 : i64, scratch_operands = 0 : i64, tpu.core_type = #tpu.core_type<tc>, window_params = [{transform_indices = @transform_0, window_bounds = array<i64: 16, 32>}, {pipeline_mode = #tpu.pipeline_mode<synchronous>, transform_indices = @transform_1, window_bounds = array<i64: 32, 256>}, {pipeline_mode = #tpu.pipeline_mode<synchronous>, transform_indices = @transform_2, window_bounds = array<i64: 1, 256>}, {pipeline_mode = #tpu.pipeline_mode<synchronous>, transform_indices = @transform_3, window_bounds = array<i64: 256, 128>}, {pipeline_mode = #tpu.pipeline_mode<synchronous>, transform_indices = @transform_4, window_bounds = array<i64: 1, 128>}, {transform_indices = @transform_5, window_bounds = array<i64: 16, 128>}]} {
    %c16_i32 = arith.constant 16 : i32
    %0 = arith.muli %arg0, %c16_i32 : i32
    %c0 = arith.constant 0 : index
    %1 = memref.load %arg1[%c0] : memref<1xi32, #tpu.memory_space<smem>>
    %c0_0 = arith.constant 0 : index
    %c0_1 = arith.constant 0 : index
    %2 = vector.load %arg2[%c0_0, %c0_1] : memref<16x32xf32, #tpu.memory_space<vmem>>, vector<16x32xf32>
    %3 = arith.truncf %2 : vector<16x32xf32> to vector<16x32xbf16>
    %c0_2 = arith.constant 0 : index
    %c0_3 = arith.constant 0 : index
    %4 = vector.load %arg3[%c0_2, %c0_3] : memref<32x256xbf16, #tpu.memory_space<vmem>>, vector<32x256xbf16>
    %cst = arith.constant dense<0.000000e+00> : vector<16x256xf32>
    %5 = tpu.matmul %3, %4, %cst {dimension_numbers = #tpu.dot_dimension_numbers<[1], [0], [0], [1], [0, 0, 1, 1], [], []>} : vector<16x32xbf16>, vector<32x256xbf16>, vector<16x256xf32> -> vector<16x256xf32>
    %c0_4 = arith.constant 0 : index
    %c0_5 = arith.constant 0 : index
    %6 = vector.load %arg4[%c0_4, %c0_5] : memref<1x256xf32, #tpu.memory_space<vmem>>, vector<1x256xf32>
    %7 = vector.broadcast %6 : vector<1x256xf32> to vector<16x256xf32>
    %8 = arith.addf %5, %7 : vector<16x256xf32>
    %cst_6 = arith.constant 0.000000e+00 : f32
    %9 = vector.broadcast %cst_6 : f32 to vector<16x256xf32>
    %10 = arith.maximumf %8, %9 : vector<16x256xf32>
    %11 = tpu.iota {dimensions = array<i32: 0>} : vector<16x256xi32>
    %12 = vector.broadcast %0 : i32 to vector<16x256xi32>
    %13 = arith.addi %11, %12 : vector<16x256xi32>
    %14 = tpu.iota {dimensions = array<i32: 1>} : vector<16x256xi32>
    %c-1640531535_i32 = arith.constant -1640531535 : i32
    %15 = vector.broadcast %c-1640531535_i32 : i32 to vector<16x256xi32>
    %16 = arith.muli %13, %15 : vector<16x256xi32>
    %c-2048144777_i32 = arith.constant -2048144777 : i32
    %17 = vector.broadcast %c-2048144777_i32 : i32 to vector<16x256xi32>
    %18 = arith.muli %14, %17 : vector<16x256xi32>
    %19 = arith.addi %16, %18 : vector<16x256xi32>
    %c668265263_i32 = arith.constant 668265263 : i32
    %20 = arith.addi %1, %c668265263_i32 : i32
    %21 = vector.broadcast %20 : i32 to vector<16x256xi32>
    %22 = arith.xori %19, %21 : vector<16x256xi32>
    %c16_i32_7 = arith.constant 16 : i32
    %23 = vector.broadcast %c16_i32_7 : i32 to vector<16x256xi32>
    %24 = arith.shrui %22, %23 : vector<16x256xi32>
    %25 = arith.xori %22, %24 : vector<16x256xi32>
    %c2146121005_i32 = arith.constant 2146121005 : i32
    %26 = vector.broadcast %c2146121005_i32 : i32 to vector<16x256xi32>
    %27 = arith.muli %25, %26 : vector<16x256xi32>
    %c15_i32 = arith.constant 15 : i32
    %28 = vector.broadcast %c15_i32 : i32 to vector<16x256xi32>
    %29 = arith.shrui %27, %28 : vector<16x256xi32>
    %30 = arith.xori %27, %29 : vector<16x256xi32>
    %c-2073254261_i32 = arith.constant -2073254261 : i32
    %31 = vector.broadcast %c-2073254261_i32 : i32 to vector<16x256xi32>
    %32 = arith.muli %30, %31 : vector<16x256xi32>
    %c16_i32_8 = arith.constant 16 : i32
    %33 = vector.broadcast %c16_i32_8 : i32 to vector<16x256xi32>
    %34 = arith.shrui %32, %33 : vector<16x256xi32>
    %35 = arith.xori %32, %34 : vector<16x256xi32>
    %c16777215_i32 = arith.constant 16777215 : i32
    %36 = vector.broadcast %c16777215_i32 : i32 to vector<16x256xi32>
    %37 = arith.andi %35, %36 : vector<16x256xi32>
    %c8388608_i32 = arith.constant 8388608 : i32
    %38 = vector.broadcast %c8388608_i32 : i32 to vector<16x256xi32>
    %39 = arith.cmpi sge, %37, %38 : vector<16x256xi32>
    %cst_9 = arith.constant 2.000000e+00 : f32
    %40 = vector.broadcast %cst_9 : f32 to vector<16x256xf32>
    %41 = arith.mulf %10, %40 : vector<16x256xf32>
    %cst_10 = arith.constant 0.000000e+00 : f32
    %42 = vector.broadcast %cst_10 : f32 to vector<16x256xf32>
    %43 = arith.select %39, %41, %42 : vector<16x256xi1>, vector<16x256xf32>
    %44 = arith.truncf %43 : vector<16x256xf32> to vector<16x256xbf16>
    %c0_11 = arith.constant 0 : index
    %c0_12 = arith.constant 0 : index
    %45 = vector.load %arg5[%c0_11, %c0_12] : memref<256x128xbf16, #tpu.memory_space<vmem>>, vector<256x128xbf16>
    %cst_13 = arith.constant dense<0.000000e+00> : vector<16x128xf32>
    %46 = tpu.matmul %44, %45, %cst_13 {dimension_numbers = #tpu.dot_dimension_numbers<[1], [0], [0], [1], [0, 0, 1, 1], [], []>} : vector<16x256xbf16>, vector<256x128xbf16>, vector<16x128xf32> -> vector<16x128xf32>
    %c0_14 = arith.constant 0 : index
    %c0_15 = arith.constant 0 : index
    %47 = vector.load %arg6[%c0_14, %c0_15] : memref<1x128xf32, #tpu.memory_space<vmem>>, vector<1x128xf32>
    %48 = vector.broadcast %47 : vector<1x128xf32> to vector<16x128xf32>
    %49 = arith.addf %46, %48 : vector<16x128xf32>
    %cst_16 = arith.constant 0.000000e+00 : f32
    %50 = vector.broadcast %cst_16 : f32 to vector<16x128xf32>
    %51 = arith.maximumf %49, %50 : vector<16x128xf32>
    %52 = tpu.iota {dimensions = array<i32: 0>} : vector<16x128xi32>
    %53 = vector.broadcast %0 : i32 to vector<16x128xi32>
    %54 = arith.addi %52, %53 : vector<16x128xi32>
    %55 = tpu.iota {dimensions = array<i32: 1>} : vector<16x128xi32>
    %c-1640531535_i32_17 = arith.constant -1640531535 : i32
    %56 = vector.broadcast %c-1640531535_i32_17 : i32 to vector<16x128xi32>
    %57 = arith.muli %54, %56 : vector<16x128xi32>
    %c-2048144777_i32_18 = arith.constant -2048144777 : i32
    %58 = vector.broadcast %c-2048144777_i32_18 : i32 to vector<16x128xi32>
    %59 = arith.muli %55, %58 : vector<16x128xi32>
    %60 = arith.addi %57, %59 : vector<16x128xi32>
    %c-972266264_i32 = arith.constant -972266264 : i32
    %61 = arith.addi %1, %c-972266264_i32 : i32
    %62 = vector.broadcast %61 : i32 to vector<16x128xi32>
    %63 = arith.xori %60, %62 : vector<16x128xi32>
    %c16_i32_19 = arith.constant 16 : i32
    %64 = vector.broadcast %c16_i32_19 : i32 to vector<16x128xi32>
    %65 = arith.shrui %63, %64 : vector<16x128xi32>
    %66 = arith.xori %63, %65 : vector<16x128xi32>
    %c2146121005_i32_20 = arith.constant 2146121005 : i32
    %67 = vector.broadcast %c2146121005_i32_20 : i32 to vector<16x128xi32>
    %68 = arith.muli %66, %67 : vector<16x128xi32>
    %c15_i32_21 = arith.constant 15 : i32
    %69 = vector.broadcast %c15_i32_21 : i32 to vector<16x128xi32>
    %70 = arith.shrui %68, %69 : vector<16x128xi32>
    %71 = arith.xori %68, %70 : vector<16x128xi32>
    %c-2073254261_i32_22 = arith.constant -2073254261 : i32
    %72 = vector.broadcast %c-2073254261_i32_22 : i32 to vector<16x128xi32>
    %73 = arith.muli %71, %72 : vector<16x128xi32>
    %c16_i32_23 = arith.constant 16 : i32
    %74 = vector.broadcast %c16_i32_23 : i32 to vector<16x128xi32>
    %75 = arith.shrui %73, %74 : vector<16x128xi32>
    %76 = arith.xori %73, %75 : vector<16x128xi32>
    %c16777215_i32_24 = arith.constant 16777215 : i32
    %77 = vector.broadcast %c16777215_i32_24 : i32 to vector<16x128xi32>
    %78 = arith.andi %76, %77 : vector<16x128xi32>
    %c8388608_i32_25 = arith.constant 8388608 : i32
    %79 = vector.broadcast %c8388608_i32_25 : i32 to vector<16x128xi32>
    %80 = arith.cmpi sge, %78, %79 : vector<16x128xi32>
    %cst_26 = arith.constant 2.000000e+00 : f32
    %81 = vector.broadcast %cst_26 : f32 to vector<16x128xf32>
    %82 = arith.mulf %51, %81 : vector<16x128xf32>
    %cst_27 = arith.constant 0.000000e+00 : f32
    %83 = vector.broadcast %cst_27 : f32 to vector<16x128xf32>
    %84 = arith.select %80, %82, %83 : vector<16x128xi1>, vector<16x128xf32>
    %c0_28 = arith.constant 0 : index
    %c0_29 = arith.constant 0 : index
    %85 = vector.load %arg7[%c0_28, %c0_29] : memref<16x128xf32, #tpu.memory_space<vmem>>, vector<16x128xf32>
    tpu.vector_store %arg7[%c0_28, %c0_29], %84 {strides = array<i32>} : memref<16x128xf32, #tpu.memory_space<vmem>>, vector<16x128xf32>,
    return
  }
  func.func @transform_0(%arg0: i32, %arg1: memref<1xi32, #tpu.memory_space<smem>>) -> (i32, i32) {
    %c0_i32 = arith.constant 0 : i32
    %c0_i32_0 = arith.constant 0 : i32
    return %arg0, %c0_i32 : i32, i32
  }
  func.func @transform_1(%arg0: i32, %arg1: memref<1xi32, #tpu.memory_space<smem>>) -> (i32, i32) {
    %c0_i32 = arith.constant 0 : i32
    %c0_i32_0 = arith.constant 0 : i32
    %c0_i32_1 = arith.constant 0 : i32
    return %c0_i32, %c0_i32_0 : i32, i32
  }
  func.func @transform_2(%arg0: i32, %arg1: memref<1xi32, #tpu.memory_space<smem>>) -> (i32, i32) {
    %c0_i32 = arith.constant 0 : i32
    %c0_i32_0 = arith.constant 0 : i32
    %c0_i32_1 = arith.constant 0 : i32
    return %c0_i32, %c0_i32_0 : i32, i32
  }
  func.func @transform_3(%arg0: i32, %arg1: memref<1xi32, #tpu.memory_space<smem>>) -> (i32, i32) {
    %c0_i32 = arith.constant 0 : i32
    %c0_i32_0 = arith.constant 0 : i32
    %c0_i32_1 = arith.constant 0 : i32
    return %c0_i32, %c0_i32_0 : i32, i32
  }
  func.func @transform_4(%arg0: i32, %arg1: memref<1xi32, #tpu.memory_space<smem>>) -> (i32, i32) {
    %c0_i32 = arith.constant 0 : i32
    %c0_i32_0 = arith.constant 0 : i32
    %c0_i32_1 = arith.constant 0 : i32
    return %c0_i32, %c0_i32_0 : i32, i32
  }
  func.func @transform_5(%arg0: i32, %arg1: memref<1xi32, #tpu.memory_space<smem>>) -> (i32, i32) {
    %c0_i32 = arith.constant 0 : i32
    %c0_i32_0 = arith.constant 0 : i32
    return %arg0, %c0_i32 : i32, i32
  }
}

</mosaic_0001>

<bundles_post_ra>
// kernel: tpu_custom_call.1
= control target key start
LH: loop header
LB: loop body
LE: loop exit
PB: predicated region body
PF: predicated region fallthrough
CT: control target
= control target key end

     0   :  { %12 = vsyncpa [#allocation5], 0  ;;  %s759_s0 = inlined_call_operand.<no memory space> [shape: s32[1], index: 0, kind: input, shape index: {}]   ;;  %s760_s1 = inlined_call_operand.hbm [shape: f32[16,32], index: 1, kind: input, shape index: {}]   ;;  %s761_s2 = inlined_call_operand.hbm [shape: bf16[32,256], index: 2, kind: input, shape index: {}]   ;;  %s762_s3 = inlined_call_operand.vmem [shape: f32[1,256], index: 3, kind: input, shape index: {}]   ;;  %s763_s4 = inlined_call_operand.hbm [shape: bf16[256,128], index: 4, kind: input, shape index: {}]   ;;  %s764_s5 = inlined_call_operand.vmem [shape: f32[1,128], index: 5, kind: input, shape index: {}]   ;;  %s765_s6 = inlined_call_operand.hbm [shape: f32[16,128], index: 6, kind: output, shape index: {}]  }
   0x1   :  { %13 = vsyncpa [#allocation8], 0 }
   0x2   :  { %14 = vsyncpa [#allocation6], 0  ;;  %s631_s21 = smov [#allocation7]   ;;  %s632_s23 = smov [#allocation4]  }
   0x3   :  { %s32_s22 = sshll.u32 %s631_s21, 4  ;;  %s20_s24 = sshll.u32 %s632_s23, 4  ;;  %s33_s22 = int_to_ptr.vmem [resolvable:$true] %s32_s22  ;;  %s675_s24 = int_to_ptr.vmem [resolvable:$true] %s20_s24 }
   0x4   :  { %s537_s27 = scalar_lea.hbm %s761_s2, 512 }
   0x5   :  { %p538_p0 = scmp.ne.s32.totalorder %s761_s2, %s537_s27  ;;  %p541_p1 = scmp.lt.u32.totalorder %s537_s27, %s761_s2 }
   0x7   :  { %p543_p2 = pnand %p541_p1, %p538_p0 }
   0x9   :  { %546 = shalt.err (!%p543_p2)
}
   0xa   :  { %s547_s8 = scalar_lea.vmem %s33_s22, 512  ;;  %p552_p4 = scmp.lt.s32.totalorder %s33_s22, %s33_s22 }
   0xb   :  { %p548_p3 = scmp.ne.s32.totalorder %s33_s22, %s547_s8  ;;  %p553_p5 = scmp.lt.s32.totalorder %s547_s8, %s547_s8 }
   0xd   :  { %p554_p6 = por %p553_p5, %p552_p4 }
   0xf   :  { %p555_p7 = pnand %p554_p6, %p548_p3 }
  0x11   :  { %558 = shalt.err (!%p555_p7)
}
  0x12   :  { %s633_s9 = smov 128   ;;  %s634_s10 = smov 8  }
  0x13   :  { %38 = dma.hbm_to_vmem [thread:$0]  %s761_s2, 512, %s33_s22, [#allocation8], %s633_s9, %s633_s9, %s634_s10  }
  0x14   :  { %s559_s15 = scalar_lea.hbm %s760_s1, 256 }
  0x15   :  { %p560_p8 = scmp.ne.s32.totalorder %s760_s1, %s559_s15  ;;  %p563_p9 = scmp.lt.u32.totalorder %s559_s15, %s760_s1 }
  0x17   :  { %p565_p10 = pnand %p563_p9, %p560_p8 }
  0x19   :  { %568 = shalt.err (!%p565_p10)
}
  0x1a   :  { %s569_s20 = scalar_lea.vmem %s675_s24, 256  ;;  %p574_p12 = scmp.lt.s32.totalorder %s675_s24, %s675_s24 }
  0x1b   :  { %p570_p11 = scmp.ne.s32.totalorder %s675_s24, %s569_s20  ;;  %p575_p13 = scmp.lt.s32.totalorder %s569_s20, %s569_s20 }
  0x1d   :  { %p576_p0 = por %p575_p13, %p574_p12 }
  0x1f   :  { %p577_p1 = pnand %p576_p0, %p570_p11 }
  0x21   :  { %580 = shalt.err (!%p577_p1)
}
  0x22   :  { %26 = dma.hbm_to_vmem [thread:$0]  %s760_s1, 256, %s675_s24, [#allocation5], %s633_s9, %s633_s9, %s634_s10  }
  0x23   :  { %s635_s22 = smov [#allocation9]   ;;  %s581_s27 = scalar_lea.hbm %s763_s4, 2048 }
  0x24   :  { %s46_s23 = sshll.u32 %s635_s22, 4  ;;  %p582_p2 = scmp.ne.s32.totalorder %s763_s4, %s581_s27  ;;  %s47_s23 = int_to_ptr.vmem [resolvable:$true] %s46_s23 }
  0x25   :  { %p585_p3 = scmp.lt.u32.totalorder %s581_s27, %s763_s4 }
  0x27   :  { %p587_p4 = pnand %p585_p3, %p582_p2 }
  0x29   :  { %590 = shalt.err (!%p587_p4)
}
  0x2a   :  { %s591_s8 = scalar_lea.vmem %s47_s23, 2048  ;;  %p596_p6 = scmp.lt.s32.totalorder %s47_s23, %s47_s23 }
  0x2b   :  { %p592_p5 = scmp.ne.s32.totalorder %s47_s23, %s591_s8  ;;  %p597_p7 = scmp.lt.s32.totalorder %s591_s8, %s591_s8 }
  0x2d   :  { %p598_p8 = por %p597_p7, %p596_p6 }
  0x2f   :  { %p599_p9 = pnand %p598_p8, %p592_p5 }
  0x31   :  { %602 = shalt.err (!%p599_p9)
}
  0x32   :  { %s636_s1 = smov 64   ;;  %s637_s24 = smov 4  }
  0x33   :  { %52 = dma.hbm_to_vmem [thread:$0]  %s763_s4, 2048, %s47_s23, [#allocation8], %s636_s1, %s636_s1, %s637_s24  }
  0x34   :  { %625 = dma.done.wait [#allocation5], 256  }
  0x35   :  { %626 = vsyncadd [#allocation5], 4294967040 }
  0x36   :  { %627 = dma.done.wait [#allocation8], 2560  }
  0x37   :  { %628 = vsyncadd [#allocation8], 4294964736  ;;  %v638_v0 = vmov 0   ;;  %v515_v1 = vld [vmem:[#allocation7 + $0x4] ss:$8 sps:$4 sm:$0xff]   ;;  %v67_v5 = vld [vmem:[#allocation4] sm:$0xff]  ;;  %v76_v24 = vlaneseq }
  0x38   :  { %142 = vmatprep.mubr.bf16.mxu0 %v638_v0  ;;  %v517_v2 = vld [vmem:[#allocation7] ss:$8 sps:$4 sm:$0xff]   ;;  %110 = vmatprep.subr.bf16.mxu0 %v515_v1  ;;  %v518_v3 = vld [vmem:[#allocation7 + $0x14] ss:$8 sps:$4 sm:$0xff]   ;;  %v520_v4 = vld [vmem:[#allocation7 + $0x10] ss:$8 sps:$4 sm:$0xff]  }
  0x39   :  { %111 = vmatpush1.bf16.msra.mxu0 %v517_v2  ;;  %v68_v6 = vld [vmem:[#allocation4 + $0x8] sm:$0xff]  ;;  %v521_v7 = vld [vmem:[#allocation9 + $0x40] sm:$0xff]   ;;  %v523_v10 = vld [vmem:[#allocation9 + $0x48] sm:$0xff]   ;;  %vm106_vm0 = vcmask 261120   ;;  %v77_v25 = vshrl.u32 %v76_v24, 7  ;;  %v164_v26 = vand.u32 127, %v76_v24 }
  0x3a   :  { %112 = vmatprep.subr.bf16.mxu0 %v518_v3  ;;  %v522_v8 = vld [vmem:[#allocation9] sm:$0xff]   ;;  %v69_v9 = vpack.c.bf16 %v68_v6, %v67_v5  ;;  %484 = vmatprep.subr.bf16.mxu1 %v521_v7  ;;  %v524_v11 = vld [vmem:[#allocation9 + $0x8] sm:$0xff]   ;;  %v525_v12 = vld [vmem:[#allocation9 + $0x50] sm:$0xff]   ;;  %s174_s14 = sadd.s32 668265263, %s759_s0  ;;  %s639_s20 = smov [#allocation10]  }
  0x3b   :  { %485 = vmatpush3.bf16.msra.mxu1 %v522_v8  ;;  %v526_v13 = vld [vmem:[#allocation9 + $0x10] sm:$0xff]   ;;  %v527_v14 = vld [vmem:[#allocation9 + $0x58] sm:$0xff]   ;;  %v529_v16 = vld [vmem:[#allocation9 + $0x60] sm:$0xff]   ;;  %v159_v27 = vadd.s32 8, %v77_v25  ;;  %v165_v28 = vadd.s32 128, %v164_v26  ;;  %v175_v35 = vstv %s174_s14  ;;  %v78_v2 = vsub.s32 0, %v77_v25 }
  0x3c   :  { %486 = vmatprep.subr.bf16.mxu1 %v523_v10  ;;  %v528_v15 = vld [vmem:[#allocation9 + $0x18] sm:$0xff]   ;;  %v530_v17 = vld [vmem:[#allocation9 + $0x20] sm:$0xff]   ;;  %v531_v18 = vld [vmem:[#allocation9 + $0x68] sm:$0xff]   ;;  %v166_v29 = vmul.u32 2654435761, %v77_v25  ;;  %s443_s2 = sshll.u32 %s639_s20, 4  ;;  %s444_s2 = int_to_ptr.vmem [resolvable:$true] %s443_s2 }
  0x3d   :  { %113 = vmatpush1.bf16.msra.mxu0 %v520_v4  ;;  %v532_v19 = vld [vmem:[#allocation9 + $0x28] sm:$0xff]   ;;  %v533_v20 = vld [vmem:[#allocation9 + $0x70] sm:$0xff]   ;;  %v535_v22 = vld [vmem:[#allocation9 + $0x78] sm:$0xff]   ;;  %v167_v30 = vmul.u32 2654435761, %v159_v27  ;;  %v82_v4 = vsub.s32 1, %v77_v25  ;;  %p608_p11 = scmp.lt.s32.totalorder %s444_s2, %s444_s2 }
  0x3e   :  { %v534_v21 = vld [vmem:[#allocation9 + $0x30] sm:$0xff]   ;;  %v536_v23 = vld [vmem:[#allocation9 + $0x38] sm:$0xff]   ;;  %v169_v31 = vmul.u32 2246822519, %v165_v28  ;;  %v168_v32 = vmul.u32 2246822519, %v164_v26 }
  0x3f   :  { %487 = vmatpush3.bf16.msra.mxu1 %v524_v11  ;;  %v74_v3 = vld [vmem:[%s762_s3] sm:$0x3]  ;;  %s408_s18 = sadd.s32 3322701032, %s759_s0 }
  0x40   :  { %460 = vmatmul.mubr.msk.bf16.vlgmr.msra.gmra.mrb[0].mxu0 %vm106_vm0, %v69_v9  ;;  %488 = vmatprep.subr.bf16.mxu1 %v525_v12  ;;  %v171_v33 = vadd.s32 %v169_v31, %v166_v29  ;;  %v173_v34 = vadd.s32 %v169_v31, %v167_v30  ;;  %v727_v36 = vadd.s32 %v168_v32, %v166_v29 }
  0x41   :  { %v729_v37 = vadd.s32 %v168_v32, %v167_v30  ;;  %v79_v9 = vrot.slane %v74_v3, %v78_v2  ;;  %v83_v10 = vrot.slane %v74_v3, %v82_v4 }
  0x42   :  { %v177_v38 = vxor.u32 %v175_v35, %v171_v33  ;;  %v179_v39 = vxor.u32 %v175_v35, %v173_v34  ;;  %v176_v40 = vxor.u32 %v175_v35, %v727_v36 }
  0x43   :  { %489 = vmatpush3.bf16.msra.mxu1 %v526_v13  ;;  %v178_v41 = vxor.u32 %v175_v35, %v729_v37 }
  0x44   :  { %490 = vmatprep.subr.bf16.mxu1 %v527_v14  ;;  %v181_v42 = vshrl.u32 %v177_v38, 16  ;;  %v183_v43 = vshrl.u32 %v179_v39, 16  ;;  %v180_v44 = vshrl.u32 %v176_v40, 16 }
  0x45   :  { %v182_v45 = vshrl.u32 %v178_v41, 16 }
  0x46   :  { %v185_v46 = vxor.u32 %v181_v42, %v177_v38  ;;  %v187_v47 = vxor.u32 %v183_v43, %v179_v39  ;;  %v184_v48 = vxor.u32 %v180_v44, %v176_v40  ;;  %v409_v39 = vstv %s408_s18 }
  0x47   :  { %491 = vmatpush3.bf16.msra.mxu1 %v528_v15  ;;  %v186_v49 = vxor.u32 %v182_v45, %v178_v41  ;;  %v410_v40 = vxor.u32 %v409_v39, %v727_v36  ;;  %v411_v41 = vxor.u32 %v409_v39, %v729_v37  ;;  %v461_v36 = vld [vmem:[%s764_s5] ss:$0 sm:$0xff]  ;;  %s603_s5 = scalar_lea.vmem %s444_s2, 256 }
  0x48   :  { %492 = vmatprep.subr.bf16.mxu1 %v529_v16  ;;  %v189_v50 = vmul.u32 2146121005, %v185_v46  ;;  %v191_v51 = vmul.u32 2146121005, %v187_v47  ;;  %p604_p10 = scmp.ne.s32.totalorder %s444_s2, %s603_s5  ;;  %p609_p12 = scmp.lt.s32.totalorder %s603_s5, %s603_s5 }
  0x49   :  { %v188_v52 = vmul.u32 2146121005, %v184_v48  ;;  %v190_v53 = vmul.u32 2146121005, %v186_v49  ;;  %v412_v42 = vshrl.u32 %v410_v40, 16  ;;  %v413_v43 = vshrl.u32 %v411_v41, 16 }
  0x4a   :  { %v193_v54 = vshrl.u32 %v189_v50, 15  ;;  %v195_v55 = vshrl.u32 %v191_v51, 15  ;;  %p610_p13 = por %p609_p12, %p608_p11 }
  0x4b   :  { %493 = vmatpush3.bf16.msra.mxu1 %v530_v17  ;;  %v192_v56 = vshrl.u32 %v188_v52, 15  ;;  %v194_v57 = vshrl.u32 %v190_v53, 15  ;;  %v414_v44 = vxor.u32 %v412_v42, %v410_v40  ;;  %v415_v45 = vxor.u32 %v413_v43, %v411_v41 }
  0x4c   :  { %494 = vmatprep.subr.bf16.mxu1 %v531_v18  ;;  %v197_v58 = vxor.u32 %v193_v54, %v189_v50  ;;  %v199_v59 = vxor.u32 %v195_v55, %v191_v51  ;;  %p611_p0 = pnand %p610_p13, %p604_p10 }
  0x4d   :  { %v196_v60 = vxor.u32 %v192_v56, %v188_v52  ;;  %v198_v61 = vxor.u32 %v194_v57, %v190_v53  ;;  %v416_v46 = vmul.u32 2146121005, %v414_v44  ;;  %v417_v47 = vmul.u32 2146121005, %v415_v45 }
  0x4e   :  { %v201_v62 = vmul.u32 2221713035, %v197_v58  ;;  %v203_v63 = vmul.u32 2221713035, %v199_v59 }
  0x4f   :  { %495 = vmatpush3.bf16.msra.mxu1 %v532_v19  ;;  %v200_v0 = vmul.u32 2221713035, %v196_v60  ;;  %v202_v1 = vmul.u32 2221713035, %v198_v61  ;;  %v418_v48 = vshrl.u32 %v416_v46, 15  ;;  %v419_v49 = vshrl.u32 %v417_v47, 15 }
  0x50   :  { %496 = vmatprep.subr.bf16.mxu1 %v533_v20  ;;  %v205_v5 = vshrl.u32 %v201_v62, 16  ;;  %v207_v6 = vshrl.u32 %v203_v63, 16 }
  0x51   :  { %v204_v7 = vshrl.u32 %v200_v0, 16  ;;  %v206_v8 = vshrl.u32 %v202_v1, 16  ;;  %v420_v50 = vxor.u32 %v418_v48, %v416_v46  ;;  %v421_v51 = vxor.u32 %v419_v49, %v417_v47 }
  0x52   :  { %v209_v11 = vxor.u32 %v205_v5, %v201_v62  ;;  %v211_v12 = vxor.u32 %v207_v6, %v203_v63 }
  0x53   :  { %497 = vmatpush3.bf16.msra.mxu1 %v534_v21  ;;  %v208_v13 = vxor.u32 %v204_v7, %v200_v0  ;;  %v210_v14 = vxor.u32 %v206_v8, %v202_v1  ;;  %v422_v52 = vmul.u32 2221713035, %v420_v50  ;;  %v423_v53 = vmul.u32 2221713035, %v421_v51 }
  0x54   :  { %498 = vmatprep.subr.bf16.mxu1 %v535_v22  ;;  %v213_v20 = vand.u32 16777215, %v209_v11  ;;  %v215_v21 = vand.u32 16777215, %v211_v12 }
  0x55   :  { %v212_v25 = vand.u32 16777215, %v208_v13  ;;  %v214_v26 = vand.u32 16777215, %v210_v14  ;;  %v424_v54 = vshrl.u32 %v422_v52, 16  ;;  %v425_v55 = vshrl.u32 %v423_v53, 16 }
  0x56   :  { %vm217_vm1 = vcmp.ge.s32.totalorder %v213_v20, 8388608  ;;  %vm219_vm2 = vcmp.ge.s32.totalorder %v215_v21, 8388608 }
  0x57   :  { %499 = vmatpush3.bf16.msra.mxu1 %v536_v23  ;;  %vm216_vm3 = vcmp.ge.s32.totalorder %v212_v25, 8388608  ;;  %vm218_vm4 = vcmp.ge.s32.totalorder %v214_v26, 8388608  ;;  %vm478_vm5 = vmpackc.low %vm219_vm2, %vm217_vm1  ;;  %v426_v56 = vxor.u32 %v424_v54, %v422_v52  ;;  %v427_v58 = vxor.u32 %v425_v55, %v423_v53 }
  0x58   :  { %vm481_vm6 = vmpackc.low %vm218_vm4, %vm216_vm3 }
  0x59   :  { %v428_v62 = vand.u32 16777215, %v426_v56  ;;  %v429_v1 = vand.u32 16777215, %v427_v58 }
  0x5b   :  { %vm430_vm7 = vcmp.ge.s32.totalorder %v428_v62, 8388608  ;;  %vm431_vm8 = vcmp.ge.s32.totalorder %v429_v1, 8388608 }
 0x113   :  { %v144_v15 = vpop.f32.mrb[0].mxu0 }
 0x114   :  { %v145_v16 = vadd.f32 %v144_v15, %v79_v9  ;;  %v146_v17 = vpop.f32.mrb[1].mxu0 }
 0x115   :  { %v147_v18 = vadd.f32 %v146_v17, %v83_v10  ;;  %v148_v19 = vpop.f32.mrb[2].mxu0 }
 0x116   :  { %v153_v22 = vmax.f32 %v145_v16, 0.0  ;;  %v149_v23 = vadd.f32 %v148_v19, %v79_v9  ;;  %v150_v24 = vpop.f32.mrb[3].mxu0 }
 0x117   :  { %v154_v27 = vmax.f32 %v147_v18, 0.0  ;;  %v151_v28 = vadd.f32 %v150_v24, %v83_v10 }
 0x118   :  { %v155_v29 = vmax.f32 %v149_v23, 0.0  ;;  %v220_v31 = vmul.f32 2.0, %v153_v22 }
 0x119   :  { %v156_v30 = vmax.f32 %v151_v28, 0.0  ;;  %v221_v33 = vmul.f32 2.0, %v154_v27 }
 0x11a   :  { %v222_v32 = vmul.f32 2.0, %v155_v29 }
 0x11b   :  { %v223_v34 = vmul.f32 2.0, %v156_v30 }
 0x11c   :  { %v482_v35 = vpack.c.bf16 %v222_v32, %v220_v31 }
 0x11d   :  { %v479_v38 = vpack.c.bf16 %v223_v34, %v221_v33 }
 0x11f   :  { %480 = vmatprep.mubr.msk.bf16.mxu1 %vm478_vm5, %v479_v38 }
 0x120   :  { %483 = vmatmul.mubr.msk.bf16.vlgmr.msra.gmra.mrb[0].mxu1 %vm481_vm6, %v482_v35 }
 0x1f3   :  { %v500_v57 = vpop.f32.mrb[0].mxu1 }
 0x1f4   :  { %v501_v37 = vpop.f32.mrb[1].mxu1 }
 0x1f5   :  { %v502_v59 = vadd.f32 %v501_v37, %v500_v57  ;;  %v503_v60 = vpop.f32.mrb[2].mxu1 }
 0x1f6   :  { %v504_v61 = vpop.f32.mrb[3].mxu1 }
 0x1f7   :  { %v400_v63 = vadd.f32 %v502_v59, %v461_v36  ;;  %v505_v0 = vadd.f32 %v504_v61, %v503_v60 }
 0x1f9   :  { %v406_v2 = vmax.f32 %v400_v63, 0.0  ;;  %v403_v3 = vadd.f32 %v505_v0, %v461_v36 }
 0x1fb   :  { %v432_v4 = vmul.f32 2.0, %v406_v2  ;;  %v407_v5 = vmax.f32 %v403_v3, 0.0 }
 0x1fd   :  { %v433_v6 = vmul.f32 2.0, %v407_v5  ;;  %v434_v7 = vsel %vm430_vm7, %v432_v4, 0.0 }
 0x1fe   :  { %436 = vst [vmem:[#allocation10] sm:$0xff] %v434_v7 }
 0x1ff   :  { %v435_v8 = vsel %vm431_vm8, %v433_v6, 0.0 }
 0x200   :  { %437 = vst [vmem:[#allocation10 + $0x8] sm:$0xff] %v435_v8 }
 0x201   :  { %614 = shalt.err (!%p611_p0)
}
 0x202   :  { %s615_s23 = scalar_lea.hbm %s765_s6, 256 }
 0x203   :  { %p616_p1 = scmp.ne.s32.totalorder %s765_s6, %s615_s23  ;;  %p619_p2 = scmp.lt.u32.totalorder %s615_s23, %s765_s6 }
 0x205   :  { %p621_p3 = pnand %p619_p2, %p616_p1 }
 0x207   :  { %624 = shalt.err (!%p621_p3)
}
 0x208   :  { %449 = dma.vmem_to_hbm [thread:$0]  %s444_s2, 256, %s765_s6, [#allocation6], %s633_s9, %s633_s9, %s634_s10  }
 0x209   :  { %629 = dma.done.wait [#allocation6], 256  }
 0x20a   :  { %630 = vsyncadd [#allocation6], 4294967040 }
 0x20b   :  { %453 = vsyncpa [#allocation5], 1 }
 0x20c   :  { %454 = vsyncpa [#allocation8], 1 }
 0x20d   :  { %455 = vsyncpa [#allocation6], 1 }

</bundles_post_ra>
